<compile_context>
chip_gen: v7x
topology: tpu7x:2x2x1
jax: 0.10.0
libtpu: 0.0.40
codegen_flags: <defaults>
</compile_context>

<pallas_src>
import functools

import jax
import jax.numpy as jnp
from jax.experimental import pallas as pl
from jax.experimental.pallas import tpu as pltpu


def _simdecoder_kernel(x_ref, w_ref, b_ref, o_ref, *, eps):
    # x_ref: (C, TN) channels-first tile (spatial on the lane axis).
    x = x_ref[...].astype(jnp.float32)

    # LayerNorm over channels (sublane axis): biased variance, eps inside rsqrt
    # — identical to the PyTorch channels_first branch.  The elementwise affine
    # (gamma/beta) is pre-folded into w_ref / b_ref by the wrapper.
    mu = jnp.mean(x, axis=0, keepdims=True)            # (1, TN)
    xc = x - mu
    var = jnp.mean(xc * xc, axis=0, keepdims=True)     # (1, TN)
    xn = xc * jax.lax.rsqrt(var + eps)                 # (C, TN)

    # 1x1 conv == (Cout_pad, C) @ (C, TN) on the MXU, bias broadcast along lanes.
    y = jnp.dot(w_ref[...].astype(jnp.float32), xn,
                preferred_element_type=jnp.float32)    # (Cout_pad, TN)
    y = y + b_ref[...].astype(jnp.float32)             # b: (Cout_pad, 1)
    o_ref[...] = y.astype(o_ref.dtype)


def simdecoder_forward(x_nchw, gamma, beta, conv_w, conv_b, encoder_stride,
                       *, eps=1e-6, tn_max=1024):
    """x_nchw: (B, C, H, W).  conv_w: PyTorch layout (Cout, Cin, 1, 1)."""
    B, C, H, W = x_nchw.shape
    s = encoder_stride
    Cout = conv_w.shape[0]
    assert Cout == s * s * 3

    HW = H * W
    x3 = x_nchw.reshape(B, C, HW)      # free reshape, stays channels-first

    # Spatial tile on the lane axis: multiple of 128 when possible, else full HW.
    if HW >= 128:
        tn = min(tn_max, (HW // 128) * 128)
    else:
        tn = HW
    n_tiles = pl.cdiv(HW, tn)

    # Fold LN affine into the 1x1-conv weight / bias (mathematically exact):
    #   y = W (gamma*xn + beta) + b = (W*gamma) xn + (W @ beta + b)
    w = conv_w.reshape(Cout, C).astype(jnp.float32)
    gamma_f = gamma.astype(jnp.float32)
    beta_f = beta.astype(jnp.float32)
    w_f = w * gamma_f[None, :]                             # (Cout, C)
    b_f = conv_b.astype(jnp.float32) + w @ beta_f          # (Cout,)

    # Pad Cout to a multiple of 8 for sublane alignment of the output tile.
    Cout_pad = ((Cout + 7) // 8) * 8
    if Cout_pad != Cout:
        w_f = jnp.pad(w_f, ((0, Cout_pad - Cout), (0, 0)))
        b_f = jnp.pad(b_f, ((0, Cout_pad - Cout),))
    b_f = b_f.reshape(Cout_pad, 1)

    kernel = functools.partial(_simdecoder_kernel, eps=eps)

    # TODO(synk): for very large C / Cout (e.g. SimMIM C=768, s=32) single-buffer
    # the resident weight (pipeline_mode=pl.Buffered(1)) / keep it bf16 and raise
    # vmem_limit_bytes; not needed at these shapes.
    y3 = pl.pallas_call(
        kernel,
        out_shape=jax.ShapeDtypeStruct((B, Cout_pad, HW), x_nchw.dtype),
        grid_spec=pltpu.PrefetchScalarGridSpec(
            num_scalar_prefetch=0,
            grid=(B, n_tiles),
            in_specs=[
                pl.BlockSpec((None, C, tn), lambda b, j: (b, 0, j)),
                pl.BlockSpec((Cout_pad, C), lambda b, j: (0, 0)),
                pl.BlockSpec((Cout_pad, 1), lambda b, j: (0, 0)),
            ],
            out_specs=pl.BlockSpec((None, Cout_pad, tn), lambda b, j: (b, 0, j)),
        ),
        compiler_params=pltpu.CompilerParams(
            dimension_semantics=("parallel", "parallel")),
    )(x3, w_f, b_f)

    # Drop the Cout padding (no-op when Cout is already a multiple of 8).
    y = y3 if Cout_pad == Cout else y3[:, :Cout, :]        # (B, Cout, HW)

    # PixelShuffle(s): (B, 3*s*s, H, W) -> (B, 3, H*s, W*s), PyTorch channel
    # ordering c*s*s + i*s + j.
    y = y.reshape(B, 3, s, s, H, W)                        # (b, c, i, j, h, w)
    y = jnp.transpose(y, (0, 1, 4, 2, 5, 3))               # (b, c, h, i, w, j)
    return y.reshape(B, 3, H * s, W * s)


def _reference_jax(x_nchw, gamma, beta, conv_w, conv_b, s, eps=1e-6):
    # Pure-JAX reference mirroring the PyTorch module.
    x = x_nchw.astype(jnp.float32)
    u = jnp.mean(x, axis=1, keepdims=True)
    v = jnp.mean((x - u) ** 2, axis=1, keepdims=True)
    xn = (x - u) / jnp.sqrt(v + eps)
    xn = gamma[None, :, None, None] * xn + beta[None, :, None, None]
    w = conv_w.reshape(conv_w.shape[0], conv_w.shape[1])   # (Cout, Cin)
    y = jnp.einsum('bchw,oc->bohw', xn, w) + conv_b[None, :, None, None]
    B, Co, H, W = y.shape
    y = y.reshape(B, 3, s, s, H, W)
    y = jnp.transpose(y, (0, 1, 4, 2, 5, 3))
    return y.reshape(B, 3, H * s, W * s)


if __name__ == "__main__":
    key = jax.random.PRNGKey(0)
    B, C, H, W = 2, 16, 8, 8
    encoder_stride = 4
    Cout = encoder_stride ** 2 * 3

    k1, k2, k3, k4, k5 = jax.random.split(key, 5)
    x = jax.random.normal(k1, (B, C, H, W), dtype=jnp.float32)
    gamma = 1.0 + 0.1 * jax.random.normal(k2, (C,), dtype=jnp.float32)
    beta = 0.1 * jax.random.normal(k3, (C,), dtype=jnp.float32)
    conv_w = 0.1 * jax.random.normal(k4, (Cout, C, 1, 1), dtype=jnp.float32)
    conv_b = 0.1 * jax.random.normal(k5, (Cout,), dtype=jnp.float32)

    out = simdecoder_forward(x, gamma, beta, conv_w, conv_b, encoder_stride)
    out = jax.block_until_ready(out)

    ref = _reference_jax(x, gamma, beta, conv_w, conv_b, encoder_stride)
    assert out.shape == (B, 3, H * encoder_stride, W * encoder_stride), out.shape
    assert jnp.allclose(out, ref, atol=1e-4, rtol=1e-4), \
        float(jnp.max(jnp.abs(out - ref)))

    print("KERNEL_OK")
</pallas_src>

<mosaic_0001>
module attributes {stable_mosaic.version = 11 : i64} {
  func.func @_simdecoder_kernel(%arg0: i32, %arg1: i32, %arg2: memref<1x16x64xf32, #tpu.memory_space<vmem>>, %arg3: memref<48x16xf32, #tpu.memory_space<vmem>>, %arg4: memref<48x1xf32, #tpu.memory_space<vmem>>, %arg5: memref<1x48x64xf32, #tpu.memory_space<vmem>>) attributes {dimension_semantics = [#tpu.dimension_semantics<parallel>, #tpu.dimension_semantics<parallel>], iteration_bounds = array<i64: 2, 1>, scalar_prefetch = 0 : i64, scratch_operands = 0 : i64, tpu.core_type = #tpu.core_type<tc>, window_params = [{transform_indices = @transform_0, window_bounds = array<i64: 1, 16, 64>}, {pipeline_mode = #tpu.pipeline_mode<synchronous>, transform_indices = @transform_1, window_bounds = array<i64: 48, 16>}, {pipeline_mode = #tpu.pipeline_mode<synchronous>, transform_indices = @transform_2, window_bounds = array<i64: 48, 1>}, {transform_indices = @transform_3, window_bounds = array<i64: 1, 48, 64>}]} {
    %c0 = arith.constant 0 : index
    %c0_0 = arith.constant 0 : index
    %c0_1 = arith.constant 0 : index
    %0 = vector.load %arg2[%c0, %c0_0, %c0_1] : memref<1x16x64xf32, #tpu.memory_space<vmem>>, vector<1x16x64xf32>
    %1 = vector.shape_cast %0 : vector<1x16x64xf32> to vector<16x64xf32>
    %cst = arith.constant dense<0.000000e+00> : vector<64xf32>
    %2 = vector.multi_reduction <add>, %1, %cst [0] : vector<16x64xf32> to vector<64xf32>
    %3 = vector.shape_cast %2 : vector<64xf32> to vector<1x64xf32>
    %cst_2 = arith.constant 1.600000e+01 : f32
    %4 = vector.broadcast %cst_2 : f32 to vector<1x64xf32>
    %5 = arith.divf %3, %4 : vector<1x64xf32>
    %6 = vector.broadcast %5 : vector<1x64xf32> to vector<16x64xf32>
    %7 = arith.subf %1, %6 : vector<16x64xf32>
    %8 = arith.mulf %7, %7 : vector<16x64xf32>
    %cst_3 = arith.constant dense<0.000000e+00> : vector<64xf32>
    %9 = vector.multi_reduction <add>, %8, %cst_3 [0] : vector<16x64xf32> to vector<64xf32>
    %10 = vector.shape_cast %9 : vector<64xf32> to vector<1x64xf32>
    %cst_4 = arith.constant 1.600000e+01 : f32
    %11 = vector.broadcast %cst_4 : f32 to vector<1x64xf32>
    %12 = arith.divf %10, %11 : vector<1x64xf32>
    %cst_5 = arith.constant 9.99999997E-7 : f32
    %13 = vector.broadcast %cst_5 : f32 to vector<1x64xf32>
    %14 = arith.addf %12, %13 : vector<1x64xf32>
    %15 = math.rsqrt %14 : vector<1x64xf32>
    %16 = vector.broadcast %15 : vector<1x64xf32> to vector<16x64xf32>
    %17 = arith.mulf %7, %16 : vector<16x64xf32>
    %c0_6 = arith.constant 0 : index
    %c0_7 = arith.constant 0 : index
    %18 = vector.load %arg3[%c0_6, %c0_7] : memref<48x16xf32, #tpu.memory_space<vmem>>, vector<48x16xf32>
    %cst_8 = arith.constant dense<0.000000e+00> : vector<48x64xf32>
    %19 = tpu.matmul %18, %17, %cst_8 {dimension_numbers = #tpu.dot_dimension_numbers<[1], [0], [0], [1], [0, 0, 1, 1], [], []>} : vector<48x16xf32>, vector<16x64xf32>, vector<48x64xf32> -> vector<48x64xf32>
    %c0_9 = arith.constant 0 : index
    %c0_10 = arith.constant 0 : index
    %20 = vector.load %arg4[%c0_9, %c0_10] : memref<48x1xf32, #tpu.memory_space<vmem>>, vector<48x1xf32>
    %21 = vector.broadcast %20 : vector<48x1xf32> to vector<48x64xf32>
    %22 = arith.addf %19, %21 : vector<48x64xf32>
    %c0_11 = arith.constant 0 : index
    %c0_12 = arith.constant 0 : index
    %c0_13 = arith.constant 0 : index
    %23 = vector.load %arg5[%c0_11, %c0_12, %c0_13] : memref<1x48x64xf32, #tpu.memory_space<vmem>>, vector<1x48x64xf32>
    %24 = vector.shape_cast %23 : vector<1x48x64xf32> to vector<48x64xf32>
    %25 = vector.shape_cast %22 : vector<48x64xf32> to vector<1x48x64xf32>
    tpu.vector_store %arg5[%c0_11, %c0_12, %c0_13], %25 {strides = array<i32>} : memref<1x48x64xf32, #tpu.memory_space<vmem>>, vector<1x48x64xf32>,
    return
  }
  func.func @transform_0(%arg0: i32, %arg1: i32) -> (i32, i32, i32) {
    %c0_i32 = arith.constant 0 : i32
    %c0_i32_0 = arith.constant 0 : i32
    return %arg0, %c0_i32, %arg1 : i32, i32, i32
  }
  func.func @transform_1(%arg0: i32, %arg1: i32) -> (i32, i32) {
    %c0_i32 = arith.constant 0 : i32
    %c0_i32_0 = arith.constant 0 : i32
    %c0_i32_1 = arith.constant 0 : i32
    return %c0_i32, %c0_i32_0 : i32, i32
  }
  func.func @transform_2(%arg0: i32, %arg1: i32) -> (i32, i32) {
    %c0_i32 = arith.constant 0 : i32
    %c0_i32_0 = arith.constant 0 : i32
    %c0_i32_1 = arith.constant 0 : i32
    return %c0_i32, %c0_i32_0 : i32, i32
  }
  func.func @transform_3(%arg0: i32, %arg1: i32) -> (i32, i32, i32) {
    %c0_i32 = arith.constant 0 : i32
    %c0_i32_0 = arith.constant 0 : i32
    return %arg0, %c0_i32, %arg1 : i32, i32, i32
  }
}

</mosaic_0001>

<bundles_post_ra>
// kernel: tpu_custom_call.1
= control target key start
LH: loop header
LB: loop body
LE: loop exit
PB: predicated region body
PF: predicated region fallthrough
CT: control target
= control target key end

     0   :  { %8 = vsyncpa [#allocation3], 0  ;;  %s860_s0 = inlined_call_operand.vmem [shape: f32[2,16,64], index: 0, kind: input, shape index: {}]   ;;  %s861_s1 = inlined_call_operand.vmem [shape: f32[48,16], index: 1, kind: input, shape index: {}]   ;;  %s862_s2 = inlined_call_operand.vmem [shape: f32[48,1], index: 2, kind: input, shape index: {}]   ;;  %s863_s3 = inlined_call_operand.hbm [shape: f32[2,48,64], index: 3, kind: output, shape index: {}]  }
   0x1   :  { %10 = vsyncpa [#allocation3 + $0x1], 0  ;;  %s693_s12 = smov 0   ;;  %s695_s13 = smov 0  }
   0x2   :  { %s697_s14 = smov 0   ;;  %s699_s15 = smov 0  }
   0x3   :  { %s701_s16 = smov 0   ;;  %s703_s17 = smov 0  }
   0x4 LB: > { %s481_s18 = sadd.s32 4294967295, %s667_s17   ;;  %s482_s19 = sadd.s32 4294967294, %s667_s17   ;;  %s667_s17 = sphi %s703_s17, %s16_s17   ;;  %s663_s16 = sphi %s701_s16, %s870_s16   ;;  %s659_s15 = sphi %s699_s15, %s869_s15   ;;  %s655_s14 = sphi %s697_s14, %s868_s14   ;;  %s651_s13 = sphi %s695_s13, %s867_s13   ;;  %s647_s12 = sphi %s693_s12, %s866_s12  }
   0x5   : > { %s28_s20 = sadd.s32 1, %s663_s16  ;;  %s107_s21 = sadd.s32 1, %s655_s14 }
   0x6   : > { %p30_p0 = scmp.ge.s32.totalorder %s28_s20, 2  ;;  %p117_p1 = scmp.ne.s32.totalorder %s655_s14, %s651_s13 }
   0x7   : > { %p118_p2 = scmp.eq.s32.totalorder %s481_s18, 1  ;;  %p123_p3 = scmp.ne.s32.totalorder %s651_s13, %s647_s12 }
   0x8   : > { %s872_s20 = smov (%p30_p0, %s28_s20), 0  ;;  %p124_p5 = scmp.eq.s32.totalorder %s482_s19, 1 }
   0x9   : > { %p733_p4 = por %p118_p2, %p117_p1  ;;  %s102_s23 = ssub.s32 %s663_s16, %s872_s20 }
   0xa   : > { %p485_p6 = scmp.ge.s32.totalorder %s667_s17, 1  ;;  %p105_p7 = scmp.eq.s32.totalorder %s102_s23, 0 }
   0xb   : > { %p740_p8 = por %p124_p5, %p123_p3  ;;  %p159_p9 = scmp.lt.s32.totalorder %s667_s17, 3 }
   0xc   : > { %s746_s25 = scalar_select %p105_p7, %s655_s14, %s107_s21  }
   0xd   : > { %p160_p10 = pnand %p485_p6, %p159_p9 }
   0xe   : > { %p186_p11 = scmp.lt.s32.totalorder (!%p160_p10), %s659_s15, 1  ;;  %v226_v0 = vld [vmem:[%s861_s1] sm:$0xff] (!%p160_p10)  ;;  %vm268_vm0 = vcmask (!%p160_p10), 130048   ;;  %v228_v1 = vld [vmem:[%s861_s1 + $0x10] sm:$0xff] (!%p160_p10)  ;;  %v669_v2 = vmov (!%p160_p10), 0   ;;  %vm196_vm1 = vcmask (!%p160_p10), 523264  }
   0xf   : > { %163 = sbr.rel (%p160_p10) target bundleno = 320 (0x140), region = 32  ;;  %510 = vmatprep.mubr.msk.f32.mxu0 (!%p160_p10), %vm268_vm0, %v226_v0  ;;  %513 = vmatprep.mubr.msk.f32.mxu1 (!%p160_p10), %vm268_vm0, %v228_v1  ;;  %v234_v3 = vld [vmem:[%s862_s2 + $0x10] sm:$0xff] (!%p160_p10)  ;;  %v232_v4 = vld [vmem:[%s862_s2] sm:$0xff] (!%p160_p10)  ;;  %v235_v5 = vld [vmem:[%s862_s2 + $0x18] sm:$0xff] (!%p160_p10)  ;;  %s183_s11 = sand.u32 (!%p160_p10), 1, %s651_s13  }
  0x10   : > { %586 = vset.pattern.permute.xlu1 (!%p160_p10), %v669_v2  ;;  %585 = vset.pattern.permute.xlu0 (!%p160_p10), %v669_v2  ;;  %v233_v6 = vld [vmem:[%s862_s2 + $0x8] sm:$0xff] (!%p160_p10)  ;;  %v236_v13 = vld [vmem:[%s862_s2 + $0x20] sm:$0xff] (!%p160_p10)  ;;  %v229_v41 = vld [vmem:[%s861_s1 + $0x18] sm:$0xff] (!%p160_p10)  ;;  %s525_s18 = smul.u32 (!%p160_p10), 48, %s183_s11  ;;  %s814_s28 = scalar_lea.sflag (!%p160_p10), [#allocation3], %s183_s11 }
  0x11   : > { %250 = vperm.xlu1 (!%p160_p10), %586, %v234_v3   ;;  %240 = vperm.xlu0 (!%p160_p10), %585, %v232_v4   ;;  %v237_v12 = vld [vmem:[%s862_s2 + $0x28] sm:$0xff] (!%p160_p10)  ;;  %v230_v42 = vld [vmem:[%s861_s1 + $0x20] sm:$0xff] (!%p160_p10)  ;;  %s526_s19 = smul.u32 (!%p160_p10), 768, %s659_s15 }
  0x12   : > { %v227_v40 = vld [vmem:[%s861_s1 + $0x8] sm:$0xff] (!%p160_p10)  ;;  %s185_s21 = scalar_lea.vmem (!%p160_p10), [#allocation2], %s525_s18 }
  0x13   : > { %v231_v43 = vld [vmem:[%s861_s1 + $0x28] sm:$0xff] (!%p160_p10)  ;;  %s808_s27 = scalar_lea.hbm (!%p160_p10), %s863_s3, %s526_s19 }
  0x15   : > { %255 = vperm.xlu1 (!%p160_p10), %586, %v235_v5   ;;  %245 = vperm.xlu0 (!%p160_p10), %585, %v233_v6  }
  0x16   : > { %s187_s30 = scalar_select %p186_p11, %s659_s15, 1 }
  0x18   : > { %s497_s8 = sshll.u32 %s187_s30, 4  ;;  %s670_s30 = smov [#allocation2]  }
  0x19   : > { %s193_s23 = scalar_lea.vmem %s860_s0, %s497_s8  ;;  %265 = vperm.xlu1 %586, %v237_v12   ;;  %260 = vperm.xlu0 %585, %v236_v13   ;;  %s593_s4 = sshll.u32 %s670_s30, 4  ;;  %s594_s4 = int_to_ptr.vmem [resolvable:$false] %s593_s4 }
  0x1a   : > { %v194_v7 = vld [vmem:[%s193_s23] sm:$0xff]  ;;  %v195_v8 = vld [vmem:[%s193_s23 + $0x8] sm:$0xff]  ;;  %s403_s23 = sshll.u32 %s185_s21, 4  ;;  %s595_s5 = scalar_lea.vmem %s594_s4, 1536  ;;  %s810_s23 = int_to_ptr.vmem [resolvable:$true] %s403_s23 }
  0x1b   : > { %v197_v9 = vsel %vm196_vm1, %v194_v7, 0.0  ;;  %v198_v10 = vsel %vm196_vm1, %v195_v8, 0.0  ;;  %s589_s29 = scalar_lea.vmem %s810_s23, 768  ;;  %p596_p1 = scmp.lt.s32.totalorder %s810_s23, %s594_s4 }
  0x1c   : > { %v199_v11 = vadd.f32 %v198_v10, %v197_v9  ;;  %p590_p12 = scmp.ne.s32.totalorder %s810_s23, %s589_s29  ;;  %p597_p2 = scmp.lt.s32.totalorder %s595_s5, %s589_s29 }
  0x1e   : > { %v200_v14 = vrot.slane %v199_v11, 4  ;;  %p591_p13 = pnand %p590_p12, %p733_p4  ;;  %p598_p3 = por %p597_p2, %p596_p1 }
  0x20   : > { %v201_v15 = vadd.f32 %v200_v14, %v199_v11  ;;  %p592_p0 = pneg %p591_p13 }
  0x22   : > { %v202_v16 = vrot.slane %v201_v15, 2  ;;  %p599_p5 = pnand %p598_p3, %p592_p0 }
  0x24   : > { %v203_v17 = vadd.f32 %v202_v16, %v201_v15 }
  0x26   : > { %v204_v18 = vrot.slane %v203_v17, 1 }
  0x28   : > { %v205_v19 = vadd.f32 %v204_v18, %v203_v17 }
  0x2a   : > { %v207_v20 = vmul.f32 0.0625, %v205_v19 }
  0x2c   : > { %v208_v21 = vsub.f32 %v194_v7, %v207_v20  ;;  %v209_v22 = vsub.f32 %v195_v8, %v207_v20 }
  0x2e   : > { %v210_v23 = vmul.f32 %v208_v21, %v208_v21  ;;  %v211_v24 = vmul.f32 %v209_v22, %v209_v22 }
  0x30   : > { %v212_v25 = vsel %vm196_vm1, %v210_v23, 0.0  ;;  %v213_v26 = vsel %vm196_vm1, %v211_v24, 0.0 }
  0x31   : > { %v214_v27 = vadd.f32 %v213_v26, %v212_v25 }
  0x33   : > { %v215_v28 = vrot.slane %v214_v27, 4 }
  0x35   : > { %v216_v29 = vadd.f32 %v215_v28, %v214_v27 }
  0x37   : > { %v217_v30 = vrot.slane %v216_v29, 2 }
  0x39   : > { %v218_v31 = vadd.f32 %v217_v30, %v216_v29 }
  0x3b   : > { %v219_v32 = vrot.slane %v218_v31, 1 }
  0x3d   : > { %v220_v33 = vadd.f32 %v219_v32, %v218_v31 }
  0x3f   : > { %v221_v34 = vmul.f32 0.0625, %v220_v33 }
  0x41   : > { %v222_v35 = vadd.f32 1e-06, %v221_v34 }
  0x43   : > { %587 = vrsqrt.f32 %v222_v35 }
  0x4d   : > { %v588_v36 = vpop.eup %587 }
  0x4e   : > { %v224_v37 = vmul.f32 %v588_v36, %v208_v21  ;;  %v225_v38 = vmul.f32 %v588_v36, %v209_v22 }
  0x50   : > { %v519_v39 = vpack.c.bf16 %v225_v38, %v224_v37 }
  0x52   : > { %520 = vmatprep.subr.bf16.mxu0 %v519_v39  ;;  %523 = vmatprep.subr.bf16.mxu1 %v519_v39 }
  0x53   : > { %522 = vmatpush3.bf16.msra.mxu0 %v519_v39  ;;  %524 = vmatpush3.bf16.msra.mxu1 %v519_v39 }
  0x56   : > { %511 = vmatmul.mubr.msk.f32.vlgmr.msra.gmra.mrb[0].mxu0 %vm268_vm0, %v227_v40  ;;  %514 = vmatmul.mubr.msk.f32.vlgmr.msra.gmra.mrb[0].mxu1 %vm268_vm0, %v229_v41 }
  0x57   : > { %516 = vmatprep.mubr.msk.f32.mxu1 %vm268_vm0, %v230_v42 }
  0x5a   : > { %517 = vmatmul.mubr.msk.f32.gmra.mrb[2].mxu1 %vm268_vm0, %v231_v43 }
  0x90   : > { %v251_v44 = vpop.permute.xlu1 %250  ;;  %v241_v45 = vpop.permute.xlu0 %240 }
  0x94   : > { %v256_v46 = vpop.permute.xlu1 %255  ;;  %v246_v47 = vpop.permute.xlu0 %245 }
  0x98   : > { %v266_v56 = vpop.permute.xlu1 %265  ;;  %v261_v58 = vpop.permute.xlu0 %260 }
 0x129   : > { %v512_v48 = vpop.f32.mrb[0].mxu0  ;;  %v515_v49 = vpop.f32.mrb[0].mxu1 }
 0x12a   : > { %v359_v50 = vadd.f32 %v512_v48, %v246_v47  ;;  %v369_v51 = vadd.f32 %v515_v49, %v256_v46  ;;  %v353_v52 = vpop.f32.mrb[1].mxu0  ;;  %v363_v53 = vpop.f32.mrb[1].mxu1 }
 0x12b   : > { %v354_v54 = vadd.f32 %v353_v52, %v241_v45  ;;  %v364_v55 = vadd.f32 %v363_v53, %v251_v44 }
 0x12c   : > { %383 = vst.msk [vmem:[%s185_s21 + $0x8] sm:$0xff] %vm196_vm1, %v359_v50  ;;  %385 = vst.msk [vmem:[%s185_s21 + $0x18] sm:$0xff] %vm196_vm1, %v369_v51 }
 0x12d   : > { %382 = vst.msk [vmem:[%s185_s21] sm:$0xff] %vm196_vm1, %v354_v54  ;;  %384 = vst.msk [vmem:[%s185_s21 + $0x10] sm:$0xff] %vm196_vm1, %v364_v55  ;;  %v518_v57 = vpop.f32.mrb[2].mxu1 }
 0x12e   : > { %v379_v59 = vadd.f32 %v518_v57, %v266_v56  ;;  %v373_v60 = vpop.f32.mrb[3].mxu1 }
 0x12f   : > { %v374_v61 = vadd.f32 %v373_v60, %v261_v58 }
 0x130   : > { %387 = vst.msk [vmem:[%s185_s21 + $0x28] sm:$0xff] %vm196_vm1, %v379_v59 }
 0x131   : > { %386 = vst.msk [vmem:[%s185_s21 + $0x20] sm:$0xff] %vm196_vm1, %v374_v61 }
 0x132   : > { %602 = shalt.err (!%p599_p5)
}
 0x133   : > { %s603_s6 = scalar_lea.hbm %s808_s27, 768  ;;  %s607_s9 = scalar_lea.hbm %s863_s3, 1536 }
 0x134   : > { %p604_p6 = scmp.ne.s32.totalorder %s808_s27, %s603_s6  ;;  %p608_p10 = scmp.lt.u32.totalorder %s808_s27, %s863_s3 }
 0x135   : > { %p609_p11 = scmp.lt.u32.totalorder %s607_s9, %s603_s6  ;;  %p611_p13 = scmp.lt.u32.totalorder %s603_s6, %s808_s27 }
 0x136   : > { %p605_p7 = pnand %p604_p6, %p733_p4 }
 0x137   : > { %p610_p12 = por %p609_p11, %p608_p10 }
 0x138   : > { %p606_p9 = pneg %p605_p7 }
 0x139   : > { %p612_p0 = por %p611_p13, %p610_p12 }
 0x13b   : > { %p613_p1 = pnand %p612_p0, %p606_p9 }
 0x13d   : > { %616 = shalt.err (!%p613_p1)
}
 0x13e   : > { %s671_s18 = smov 128   ;;  %s672_s19 = smov 8  }
 0x13f   : > { %527 = dma.vmem_to_hbm [thread:$0]  (%p733_p4), %s810_s23, 768, %s808_s27, %s814_s28, %s671_s18, %s671_s18, %s672_s19  }
 0x140 PF: > { %p533_p2 = scmp.ge.s32.totalorder %s667_s17, 2  ;;  %s418_s21 = sand.u32 1, %s647_s12  }
 0x141   : > { %s419_s26 = scalar_lea.sflag [#allocation3], %s418_s21 }
 0x142   : > { %p530_p3 = pnand %p533_p2, %p740_p8 }
 0x144   : > { %642 = dma.done.wait (!%p530_p3), %s419_s26, 768  }
 0x145   : > { %644 = vsyncadd (!%p530_p3), %s419_s26, 4294966528  ;;  %s16_s17 = sadd.s32 1, %s667_s17   ;;  %s866_s12 = smov %s651_s13 }
 0x146   : > { %p13_p5 = scmp.ge.s32.totalorder %s16_s17, 4   ;;  %s867_s13 = smov %s655_s14 }
 0x147   : > { %s868_s14 = smov %s746_s25  ;;  %s869_s15 = smov %s663_s16 }
 0x148   : > { %s870_s16 = smov %s872_s20  ;;  %15 = sbr.rel (!%p13_p5) target bundleno = 4 (0x4), region = 67 }
 0x14f   :  { %424 = vsyncpa [#allocation3], 1 }
 0x150   :  { %426 = vsyncpa [#allocation3 + $0x1], 1 }

</bundles_post_ra>
